<compile_context>
chip_gen: v5e
topology: v5e:2x2
jax: 0.10.0
libtpu: 0.0.40
codegen_flags: <defaults>
</compile_context>

<pallas_src>
import jax
import jax.numpy as jnp
import numpy as np
from jax.experimental import pallas as pl
from jax.experimental.pallas import tpu as pltpu

# ---------------- configuration (mirrors MultiHeadAttention.__init__) --------
NODE_FEAT_DIM = 16
EDGE_FEAT_DIM = 8
TIME_FEAT_DIM = 16
NUM_HEADS = 2
QUERY_DIM = NODE_FEAT_DIM + TIME_FEAT_DIM                 # 32
KEY_DIM = NODE_FEAT_DIM + EDGE_FEAT_DIM + TIME_FEAT_DIM   # 40
HEAD_DIM = QUERY_DIM // NUM_HEADS                         # 16
HD = NUM_HEADS * HEAD_DIM                                 # 32
SCALE = HEAD_DIM ** (-0.5)
LN_EPS = 1e-5                                             # torch.nn.LayerNorm default


def _round_up(x, m):
    return (x + m - 1) // m * m


def _is_v7x():
    """v7x has 2 TensorCores and only 64 MiB VMEM -> different TB / VMEM caps."""
    try:
        kind = jax.devices()[0].device_kind.lower()
        return "v7" in kind or "7x" in kind
    except Exception:
        return False


def mha_kernel(q_in_ref, kv_ref, mask_ref,
               wq_ref, wkv_ref, wfc_ref, bfc_ref, gamma_ref, beta_ref,
               out_ref):
    """TB batch elements per grid step: batched MXU projections, masked softmax
    attention on the VPU/XLU/EUP, residual FC, residual add and layer norm,
    all written as one fused lane-contiguous output slab."""
    TB = q_in_ref.shape[0]
    N = mask_ref.shape[1]

    q_in = q_in_ref[...]                                   # (TB, QUERY_DIM) == residual (f32)
    invalid = mask_ref[...] == 0.0                         # hoisted out of the head loop

    # ---- projections as big batched MXU matmuls --------------------------------
    # SCALE is pre-folded into Wq; Wk||Wv are fused. kv arrives pre-flattened as
    # (TB*N, KEY_DIM) (possibly bf16); accumulation is forced to f32.
    q = jnp.dot(q_in, wq_ref[...], preferred_element_type=jnp.float32)           # (TB, HD)
    kvp = jnp.dot(kv_ref[...], wkv_ref[...], preferred_element_type=jnp.float32)  # (TB*N, 2*HD)
    kvp = kvp.reshape(TB, N, 2 * HD)                       # sublane-split: layout-preserving
    k = kvp[:, :, :HD]                                     # (TB, N, HD)
    v = kvp[:, :, HD:]                                     # (TB, N, HD)

    # ---- QK^T on the VPU: broadcast-multiply, per-head lane reduce -------------
    prod = q[:, None, :] * k                               # (TB, N, HD)

    probs = []
    for h in range(NUM_HEADS):                             # static unroll (NUM_HEADS == 2)
        sl = slice(h * HEAD_DIM, (h + 1) * HEAD_DIM)
        s = jnp.sum(prod[:, :, sl], axis=-1)               # (TB, N)
        s = jnp.where(invalid, -1.0e10, s)                 # masked_fill(mask == 0, -1e10)
        m = jnp.max(s, axis=-1, keepdims=True)
        e = jnp.exp(s - m)
        denom = jnp.sum(e, axis=-1, keepdims=True)
        probs.append(e * pl.reciprocal(denom, approx=True))   # divide on the EUP slot
    # TODO(synk): nn.Dropout is treated as identity (eval-mode semantics).

    # ---- both heads' P@V with a single broadcast-mul + one sublane reduce ------
    p_b = jnp.concatenate(
        [jnp.broadcast_to(probs[h][:, :, None], (TB, N, HEAD_DIM))
         for h in range(NUM_HEADS)], axis=-1)              # (TB, N, HD)
    attn_out = jnp.sum(p_b * v, axis=1)                    # (TB, HD)

    # ---- residual_fc (with bias), residual add, layer norm ----------------------
    fc = jnp.dot(attn_out, wfc_ref[...], preferred_element_type=jnp.float32) + bfc_ref[...]
    res = fc + q_in                                        # (TB, QUERY_DIM)
    mean = jnp.mean(res, axis=-1, keepdims=True)
    var = jnp.mean(jnp.square(res - mean), axis=-1, keepdims=True)
    normed = (res - mean) * jax.lax.rsqrt(var + LN_EPS) * gamma_ref[...] + beta_ref[...]

    # ---- single fused output slab: [normed(32) | head0 probs(N) | head1 probs(N)]
    out_ref[...] = jnp.concatenate([normed] + probs, axis=-1)


def prepare_params(params):
    """One-time packing of torch-layout params for the kernel:
    fold the attention scaling into Wq and fuse Wk||Wv along the output dim."""
    return {
        "wq": params["wq"] * SCALE,                                    # (QUERY_DIM, HD)
        "wkv": jnp.concatenate([params["wk"], params["wv"]], axis=1),  # (KEY_DIM, 2*HD)
        "wfc": params["wfc"],
        "bfc": params["bfc"],
        "gamma": params["gamma"],
        "beta": params["beta"],
    }


def multi_head_attention(node_features, node_time_features,
                         neighbor_node_features, neighbor_node_time_features,
                         neighbor_node_edge_features, neighbor_masks,
                         prepared_params, *, max_tb=None, kv_dtype=jnp.float32):
    B = node_features.shape[0]
    N = neighbor_node_features.shape[1]
    is_v7 = _is_v7x()

    if max_tb is None:
        # Primary tuning knob. Sweep 512/1024/2048 on v5e/v6e (128 MiB VMEM),
        # 256/512/1024 on v7x (64 MiB VMEM).
        max_tb = 512 if is_v7 else 1024

    # glue: build query / key-value inputs (concats) and 2-D float mask
    q_in = jnp.concatenate([node_features, node_time_features[:, 0, :]], axis=1)  # (B, QUERY_DIM)
    kv_in = jnp.concatenate([neighbor_node_features,
                             neighbor_node_edge_features,
                             neighbor_node_time_features], axis=2)                # (B, N, KEY_DIM)
    mask = neighbor_masks.astype(jnp.float32)                                     # (B, N)

    # batch tile: multiple of 8 sublanes, capped at max_tb
    TB = min(max_tb, _round_up(B, 8))
    if is_v7 and B > 8 and B <= TB:
        # v7x has 2 TensorCores: keep >= 2 grid steps so the "parallel" batch
        # axis can actually be sharded across both cores.
        TB = min(TB, _round_up((B + 1) // 2, 8))
    B_pad = _round_up(B, TB)
    if B_pad != B:
        pad = B_pad - B
        q_in = jnp.pad(q_in, ((0, pad), (0, 0)))
        kv_in = jnp.pad(kv_in, ((0, pad), (0, 0), (0, 0)))
        # pad mask rows with 1s so padded rows produce a well-defined softmax
        mask = jnp.pad(mask, ((0, pad), (0, 0)), constant_values=1.0)

    # Flatten kv to the matmul layout (rows = batch*neighbor) in the wrapper so
    # the kernel never reshapes the ref. Optionally cast the dominant HBM
    # stream (kv + its fused weight) to bf16; accumulation/softmax/LN stay f32.
    kv_flat = kv_in.reshape(B_pad * N, KEY_DIM).astype(kv_dtype)

    p = prepared_params
    wkv = p["wkv"].astype(kv_dtype)

    OUT_W = QUERY_DIM + NUM_HEADS * N
    out_shape = jax.ShapeDtypeStruct((B_pad, OUT_W), jnp.float32)

    grid_spec = pltpu.PrefetchScalarGridSpec(
        num_scalar_prefetch=0,
        grid=(B_pad // TB,),
        in_specs=[
            pl.BlockSpec((TB, QUERY_DIM), lambda i: (i, 0)),          # q_in
            # NOTE: if a v5e profile shows exposed kv DMA, bump only this spec
            # to pipeline_mode=pl.Buffered(3).
            pl.BlockSpec((TB * N, KEY_DIM), lambda i: (i, 0)),        # kv (pre-flattened)
            pl.BlockSpec((TB, N), lambda i: (i, 0)),                  # mask
            pl.BlockSpec((QUERY_DIM, HD), lambda i: (0, 0)),          # Wq (scale folded in)
            pl.BlockSpec((KEY_DIM, 2 * HD), lambda i: (0, 0)),        # Wk||Wv fused
            pl.BlockSpec((HD, QUERY_DIM), lambda i: (0, 0)),          # Wfc
            pl.BlockSpec((1, QUERY_DIM), lambda i: (0, 0)),           # b_fc
            pl.BlockSpec((1, QUERY_DIM), lambda i: (0, 0)),           # gamma
            pl.BlockSpec((1, QUERY_DIM), lambda i: (0, 0)),           # beta
        ],
        out_specs=pl.BlockSpec((TB, OUT_W), lambda i: (i, 0)),        # merged out||attn slab
    )

    # Generation-tuned scoped VMEM: v7x has only 64 MiB physical; v5e/v6e 128 MiB.
    vmem_limit = (44 if is_v7 else 80) * 1024 * 1024

    slab = pl.pallas_call(
        mha_kernel,
        out_shape=out_shape,
        grid_spec=grid_spec,
        compiler_params=pltpu.CompilerParams(
            dimension_semantics=("parallel",),
            vmem_limit_bytes=vmem_limit),
    )(q_in, kv_flat, mask, p["wq"], wkv, p["wfc"], p["bfc"], p["gamma"], p["beta"])

    # output.squeeze(dim=1) -> (B, QUERY_DIM); attention_scores.squeeze(dim=2) -> (B, H, N)
    out = slab[:B, :QUERY_DIM]
    attn = slab[:B, QUERY_DIM:].reshape(B, NUM_HEADS, N)
    return out, attn


def reference_jax(node_features, node_time_features,
                  neighbor_node_features, neighbor_node_time_features,
                  neighbor_node_edge_features, neighbor_masks, params):
    """Pure-JAX reference mirroring the PyTorch forward (dropout = identity)."""
    q_in = jnp.concatenate([node_features[:, None, :], node_time_features], axis=2)
    kv = jnp.concatenate([neighbor_node_features,
                          neighbor_node_edge_features,
                          neighbor_node_time_features], axis=2)
    B, N = neighbor_masks.shape
    q = (q_in @ params["wq"]).reshape(B, 1, NUM_HEADS, HEAD_DIM).transpose(0, 2, 1, 3)
    k = (kv @ params["wk"]).reshape(B, N, NUM_HEADS, HEAD_DIM).transpose(0, 2, 1, 3)
    v = (kv @ params["wv"]).reshape(B, N, NUM_HEADS, HEAD_DIM).transpose(0, 2, 1, 3)
    att = jnp.einsum('bhld,bhnd->bhln', q, k) * SCALE
    m = (neighbor_masks == 0)[:, None, None, :]
    att = jnp.where(m, -1.0e10, att)
    att = jax.nn.softmax(att, axis=-1)
    ao = jnp.einsum('bhln,bhnd->bhld', att, v).transpose(0, 2, 1, 3).reshape(B, 1, -1)
    out = ao @ params["wfc"] + params["bfc"]
    res = out + q_in
    mean = res.mean(-1, keepdims=True)
    var = ((res - mean) ** 2).mean(-1, keepdims=True)
    out = (res - mean) / jnp.sqrt(var + LN_EPS) * params["gamma"] + params["beta"]
    return out[:, 0, :], att[:, :, 0, :]


def init_params(key):
    ks = jax.random.split(key, 5)
    return {
        # already stored transposed w.r.t. torch nn.Linear.weight: y = x @ W
        "wq": jax.random.normal(ks[0], (QUERY_DIM, HD), jnp.float32) * 0.1,
        "wk": jax.random.normal(ks[1], (KEY_DIM, HD), jnp.float32) * 0.1,
        "wv": jax.random.normal(ks[2], (KEY_DIM, HD), jnp.float32) * 0.1,
        "wfc": jax.random.normal(ks[3], (HD, QUERY_DIM), jnp.float32) * 0.1,
        "bfc": jax.random.normal(ks[4], (1, QUERY_DIM), jnp.float32) * 0.1,
        "gamma": jnp.ones((1, QUERY_DIM), jnp.float32),
        "beta": jnp.zeros((1, QUERY_DIM), jnp.float32),
    }


def _make_inputs(key, B, N):
    k1, k2, k3, k4, k5, k6 = jax.random.split(key, 6)
    node_features = jax.random.normal(k1, (B, NODE_FEAT_DIM), jnp.float32)
    node_time_features = jax.random.normal(k2, (B, 1, TIME_FEAT_DIM), jnp.float32)
    neighbor_node_features = jax.random.normal(k3, (B, N, NODE_FEAT_DIM), jnp.float32)
    neighbor_node_time_features = jax.random.normal(k4, (B, N, TIME_FEAT_DIM), jnp.float32)
    neighbor_node_edge_features = jax.random.normal(k5, (B, N, EDGE_FEAT_DIM), jnp.float32)
    # mask: nonzero = valid neighbor; guarantee at least one valid neighbor per row
    neighbor_masks = (jax.random.uniform(k6, (B, N)) > 0.3).astype(jnp.float32)
    neighbor_masks = neighbor_masks.at[:, 0].set(1.0)
    return (node_features, node_time_features, neighbor_node_features,
            neighbor_node_time_features, neighbor_node_edge_features, neighbor_masks)


if __name__ == "__main__":
    key = jax.random.PRNGKey(0)
    kin1, kin2, kin3, kp = jax.random.split(key, 4)

    params = init_params(kp)
    prepped = prepare_params(params)

    # case 1: small batch (single grid step), f32
    inputs = _make_inputs(kin1, 4, 8)
    out, attn = jax.block_until_ready(multi_head_attention(*inputs, prepped))
    out_ref, attn_ref = reference_jax(*inputs, params)
    assert out.shape == (4, QUERY_DIM)
    assert attn.shape == (4, NUM_HEADS, 8)
    np.testing.assert_allclose(np.asarray(out), np.asarray(out_ref), rtol=1e-3, atol=1e-3)
    np.testing.assert_allclose(np.asarray(attn), np.asarray(attn_ref), rtol=1e-3, atol=1e-3)

    # case 2: batch that needs padding and >1 grid step, f32
    inputs2 = _make_inputs(kin2, 20, 8)
    out2, attn2 = jax.block_until_ready(
        multi_head_attention(*inputs2, prepped, max_tb=16))
    out2_ref, attn2_ref = reference_jax(*inputs2, params)
    assert out2.shape == (20, QUERY_DIM)
    assert attn2.shape == (20, NUM_HEADS, 8)
    np.testing.assert_allclose(np.asarray(out2), np.asarray(out2_ref), rtol=1e-3, atol=1e-3)
    np.testing.assert_allclose(np.asarray(attn2), np.asarray(attn2_ref), rtol=1e-3, atol=1e-3)

    # case 3: bf16 kv stream (dominant HBM traffic halved); accumulation stays f32
    inputs3 = _make_inputs(kin3, 64, 8)
    out3, attn3 = jax.block_until_ready(
        multi_head_attention(*inputs3, prepped, kv_dtype=jnp.bfloat16))
    out3_ref, attn3_ref = reference_jax(*inputs3, params)
    assert out3.shape == (64, QUERY_DIM)
    assert attn3.shape == (64, NUM_HEADS, 8)
    np.testing.assert_allclose(np.asarray(out3), np.asarray(out3_ref), rtol=2e-2, atol=2e-2)
    np.testing.assert_allclose(np.asarray(attn3), np.asarray(attn3_ref), rtol=2e-2, atol=2e-2)

    print("KERNEL_OK")
</pallas_src>

<mosaic_0001>
module attributes {stable_mosaic.version = 11 : i64} {
  func.func @mha_kernel(%arg0: i32, %arg1: memref<8x32xf32, #tpu.memory_space<vmem>>, %arg2: memref<64x40xf32, #tpu.memory_space<vmem>>, %arg3: memref<8x8xf32, #tpu.memory_space<vmem>>, %arg4: memref<32x32xf32, #tpu.memory_space<vmem>>, %arg5: memref<40x64xf32, #tpu.memory_space<vmem>>, %arg6: memref<32x32xf32, #tpu.memory_space<vmem>>, %arg7: memref<1x32xf32, #tpu.memory_space<vmem>>, %arg8: memref<1x32xf32, #tpu.memory_space<vmem>>, %arg9: memref<1x32xf32, #tpu.memory_space<vmem>>, %arg10: memref<8x48xf32, #tpu.memory_space<vmem>>) attributes {dimension_semantics = [#tpu.dimension_semantics<parallel>], iteration_bounds = array<i64: 1>, scalar_prefetch = 0 : i64, scratch_operands = 0 : i64, tpu.core_type = #tpu.core_type<tc>, window_params = [{transform_indices = @transform_0, window_bounds = array<i64: 8, 32>}, {transform_indices = @transform_1, window_bounds = array<i64: 64, 40>}, {transform_indices = @transform_2, window_bounds = array<i64: 8, 8>}, {pipeline_mode = #tpu.pipeline_mode<synchronous>, transform_indices = @transform_3, window_bounds = array<i64: 32, 32>}, {pipeline_mode = #tpu.pipeline_mode<synchronous>, transform_indices = @transform_4, window_bounds = array<i64: 40, 64>}, {pipeline_mode = #tpu.pipeline_mode<synchronous>, transform_indices = @transform_5, window_bounds = array<i64: 32, 32>}, {pipeline_mode = #tpu.pipeline_mode<synchronous>, transform_indices = @transform_6, window_bounds = array<i64: 1, 32>}, {pipeline_mode = #tpu.pipeline_mode<synchronous>, transform_indices = @transform_7, window_bounds = array<i64: 1, 32>}, {pipeline_mode = #tpu.pipeline_mode<synchronous>, transform_indices = @transform_8, window_bounds = array<i64: 1, 32>}, {transform_indices = @transform_9, window_bounds = array<i64: 8, 48>}]} {
    %c0 = arith.constant 0 : index
    %c0_0 = arith.constant 0 : index
    %0 = vector.load %arg1[%c0, %c0_0] : memref<8x32xf32, #tpu.memory_space<vmem>>, vector<8x32xf32>
    %c0_1 = arith.constant 0 : index
    %c0_2 = arith.constant 0 : index
    %1 = vector.load %arg3[%c0_1, %c0_2] : memref<8x8xf32, #tpu.memory_space<vmem>>, vector<8x8xf32>
    %cst = arith.constant 0.000000e+00 : f32
    %2 = vector.broadcast %cst : f32 to vector<8x8xf32>
    %3 = arith.cmpf oeq, %1, %2 : vector<8x8xf32>
    %c0_3 = arith.constant 0 : index
    %c0_4 = arith.constant 0 : index
    %4 = vector.load %arg4[%c0_3, %c0_4] : memref<32x32xf32, #tpu.memory_space<vmem>>, vector<32x32xf32>
    %cst_5 = arith.constant dense<0.000000e+00> : vector<8x32xf32>
    %5 = tpu.matmul %0, %4, %cst_5 {dimension_numbers = #tpu.dot_dimension_numbers<[1], [0], [0], [1], [0, 0, 1, 1], [], []>} : vector<8x32xf32>, vector<32x32xf32>, vector<8x32xf32> -> vector<8x32xf32>
    %c0_6 = arith.constant 0 : index
    %c0_7 = arith.constant 0 : index
    %6 = vector.load %arg2[%c0_6, %c0_7] : memref<64x40xf32, #tpu.memory_space<vmem>>, vector<64x40xf32>
    %c0_8 = arith.constant 0 : index
    %c0_9 = arith.constant 0 : index
    %7 = vector.load %arg5[%c0_8, %c0_9] : memref<40x64xf32, #tpu.memory_space<vmem>>, vector<40x64xf32>
    %cst_10 = arith.constant dense<0.000000e+00> : vector<64x64xf32>
    %8 = tpu.matmul %6, %7, %cst_10 {dimension_numbers = #tpu.dot_dimension_numbers<[1], [0], [0], [1], [0, 0, 1, 1], [], []>} : vector<64x40xf32>, vector<40x64xf32>, vector<64x64xf32> -> vector<64x64xf32>
    %9 = vector.shape_cast %8 : vector<64x64xf32> to vector<8x8x64xf32>
    %10 = vector.extract_strided_slice %9 {offsets = [0, 0, 0], sizes = [8, 8, 32], strides = [1, 1, 1]} : vector<8x8x64xf32> to vector<8x8x32xf32>
    %11 = vector.extract_strided_slice %9 {offsets = [0, 0, 32], sizes = [8, 8, 32], strides = [1, 1, 1]} : vector<8x8x64xf32> to vector<8x8x32xf32>
    %12 = vector.shape_cast %5 : vector<8x32xf32> to vector<8x1x32xf32>
    %13 = vector.broadcast %12 : vector<8x1x32xf32> to vector<8x8x32xf32>
    %14 = arith.mulf %13, %10 : vector<8x8x32xf32>
    %15 = vector.extract_strided_slice %14 {offsets = [0, 0, 0], sizes = [8, 8, 16], strides = [1, 1, 1]} : vector<8x8x32xf32> to vector<8x8x16xf32>
    %cst_11 = arith.constant dense<0.000000e+00> : vector<8x8xf32>
    %16 = vector.multi_reduction <add>, %15, %cst_11 [2] : vector<8x8x16xf32> to vector<8x8xf32>
    %cst_12 = arith.constant -1.000000e+10 : f32
    %17 = vector.broadcast %cst_12 : f32 to vector<8x8xf32>
    %18 = arith.select %3, %17, %16 : vector<8x8xi1>, vector<8x8xf32>
    %cst_13 = arith.constant dense<0xFF800000> : vector<8xf32>
    %19 = vector.multi_reduction <maximumf>, %18, %cst_13 [1] : vector<8x8xf32> to vector<8xf32>
    %20 = vector.shape_cast %19 : vector<8xf32> to vector<8x1xf32>
    %21 = vector.broadcast %20 : vector<8x1xf32> to vector<8x8xf32>
    %22 = arith.subf %18, %21 : vector<8x8xf32>
    %23 = math.exp %22 : vector<8x8xf32>
    %cst_14 = arith.constant dense<0.000000e+00> : vector<8xf32>
    %24 = vector.multi_reduction <add>, %23, %cst_14 [1] : vector<8x8xf32> to vector<8xf32>
    %25 = vector.shape_cast %24 : vector<8xf32> to vector<8x1xf32>
    %26 = tpu.reciprocal %25 {approx = true} : vector<8x1xf32> -> vector<8x1xf32>
    %27 = vector.broadcast %26 : vector<8x1xf32> to vector<8x8xf32>
    %28 = arith.mulf %23, %27 : vector<8x8xf32>
    %29 = vector.extract_strided_slice %14 {offsets = [0, 0, 16], sizes = [8, 8, 16], strides = [1, 1, 1]} : vector<8x8x32xf32> to vector<8x8x16xf32>
    %cst_15 = arith.constant dense<0.000000e+00> : vector<8x8xf32>
    %30 = vector.multi_reduction <add>, %29, %cst_15 [2] : vector<8x8x16xf32> to vector<8x8xf32>
    %cst_16 = arith.constant -1.000000e+10 : f32
    %31 = vector.broadcast %cst_16 : f32 to vector<8x8xf32>
    %32 = arith.select %3, %31, %30 : vector<8x8xi1>, vector<8x8xf32>
    %cst_17 = arith.constant dense<0xFF800000> : vector<8xf32>
    %33 = vector.multi_reduction <maximumf>, %32, %cst_17 [1] : vector<8x8xf32> to vector<8xf32>
    %34 = vector.shape_cast %33 : vector<8xf32> to vector<8x1xf32>
    %35 = vector.broadcast %34 : vector<8x1xf32> to vector<8x8xf32>
    %36 = arith.subf %32, %35 : vector<8x8xf32>
    %37 = math.exp %36 : vector<8x8xf32>
    %cst_18 = arith.constant dense<0.000000e+00> : vector<8xf32>
    %38 = vector.multi_reduction <add>, %37, %cst_18 [1] : vector<8x8xf32> to vector<8xf32>
    %39 = vector.shape_cast %38 : vector<8xf32> to vector<8x1xf32>
    %40 = tpu.reciprocal %39 {approx = true} : vector<8x1xf32> -> vector<8x1xf32>
    %41 = vector.broadcast %40 : vector<8x1xf32> to vector<8x8xf32>
    %42 = arith.mulf %37, %41 : vector<8x8xf32>
    %43 = vector.shape_cast %28 : vector<8x8xf32> to vector<8x8x1xf32>
    %44 = vector.shape_cast %43 : vector<8x8x1xf32> to vector<8x8x1xf32>
    %45 = vector.broadcast %44 : vector<8x8x1xf32> to vector<8x8x16xf32>
    %46 = vector.shape_cast %42 : vector<8x8xf32> to vector<8x8x1xf32>
    %47 = vector.shape_cast %46 : vector<8x8x1xf32> to vector<8x8x1xf32>
    %48 = vector.broadcast %47 : vector<8x8x1xf32> to vector<8x8x16xf32>
    %49 = tpu.concatenate %45, %48 in 2 : vector<8x8x16xf32>, vector<8x8x16xf32> -> vector<8x8x32xf32>
    %50 = arith.mulf %49, %11 : vector<8x8x32xf32>
    %cst_19 = arith.constant dense<0.000000e+00> : vector<8x32xf32>
    %51 = vector.multi_reduction <add>, %50, %cst_19 [1] : vector<8x8x32xf32> to vector<8x32xf32>
    %c0_20 = arith.constant 0 : index
    %c0_21 = arith.constant 0 : index
    %52 = vector.load %arg6[%c0_20, %c0_21] : memref<32x32xf32, #tpu.memory_space<vmem>>, vector<32x32xf32>
    %cst_22 = arith.constant dense<0.000000e+00> : vector<8x32xf32>
    %53 = tpu.matmul %51, %52, %cst_22 {dimension_numbers = #tpu.dot_dimension_numbers<[1], [0], [0], [1], [0, 0, 1, 1], [], []>} : vector<8x32xf32>, vector<32x32xf32>, vector<8x32xf32> -> vector<8x32xf32>
    %c0_23 = arith.constant 0 : index
    %c0_24 = arith.constant 0 : index
    %54 = vector.load %arg7[%c0_23, %c0_24] : memref<1x32xf32, #tpu.memory_space<vmem>>, vector<1x32xf32>
    %55 = vector.broadcast %54 : vector<1x32xf32> to vector<8x32xf32>
    %56 = arith.addf %53, %55 : vector<8x32xf32>
    %57 = arith.addf %56, %0 : vector<8x32xf32>
    %cst_25 = arith.constant dense<0.000000e+00> : vector<8xf32>
    %58 = vector.multi_reduction <add>, %57, %cst_25 [1] : vector<8x32xf32> to vector<8xf32>
    %59 = vector.shape_cast %58 : vector<8xf32> to vector<8x1xf32>
    %cst_26 = arith.constant 3.200000e+01 : f32
    %60 = vector.broadcast %cst_26 : f32 to vector<8x1xf32>
    %61 = arith.divf %59, %60 : vector<8x1xf32>
    %62 = vector.broadcast %61 : vector<8x1xf32> to vector<8x32xf32>
    %63 = arith.subf %57, %62 : vector<8x32xf32>
    %64 = arith.mulf %63, %63 : vector<8x32xf32>
    %cst_27 = arith.constant dense<0.000000e+00> : vector<8xf32>
    %65 = vector.multi_reduction <add>, %64, %cst_27 [1] : vector<8x32xf32> to vector<8xf32>
    %66 = vector.shape_cast %65 : vector<8xf32> to vector<8x1xf32>
    %cst_28 = arith.constant 3.200000e+01 : f32
    %67 = vector.broadcast %cst_28 : f32 to vector<8x1xf32>
    %68 = arith.divf %66, %67 : vector<8x1xf32>
    %69 = vector.broadcast %61 : vector<8x1xf32> to vector<8x32xf32>
    %70 = arith.subf %57, %69 : vector<8x32xf32>
    %cst_29 = arith.constant 9.99999974E-6 : f32
    %71 = vector.broadcast %cst_29 : f32 to vector<8x1xf32>
    %72 = arith.addf %68, %71 : vector<8x1xf32>
    %73 = math.rsqrt %72 : vector<8x1xf32>
    %74 = vector.broadcast %73 : vector<8x1xf32> to vector<8x32xf32>
    %75 = arith.mulf %70, %74 : vector<8x32xf32>
    %c0_30 = arith.constant 0 : index
    %c0_31 = arith.constant 0 : index
    %76 = vector.load %arg8[%c0_30, %c0_31] : memref<1x32xf32, #tpu.memory_space<vmem>>, vector<1x32xf32>
    %77 = vector.broadcast %76 : vector<1x32xf32> to vector<8x32xf32>
    %78 = arith.mulf %75, %77 : vector<8x32xf32>
    %c0_32 = arith.constant 0 : index
    %c0_33 = arith.constant 0 : index
    %79 = vector.load %arg9[%c0_32, %c0_33] : memref<1x32xf32, #tpu.memory_space<vmem>>, vector<1x32xf32>
    %80 = vector.broadcast %79 : vector<1x32xf32> to vector<8x32xf32>
    %81 = arith.addf %78, %80 : vector<8x32xf32>
    %82 = tpu.concatenate %81, %28, %42 in 1 : vector<8x32xf32>, vector<8x8xf32>, vector<8x8xf32> -> vector<8x48xf32>
    %c0_34 = arith.constant 0 : index
    %c0_35 = arith.constant 0 : index
    %83 = vector.load %arg10[%c0_34, %c0_35] : memref<8x48xf32, #tpu.memory_space<vmem>>, vector<8x48xf32>
    tpu.vector_store %arg10[%c0_34, %c0_35], %82 {strides = array<i32>} : memref<8x48xf32, #tpu.memory_space<vmem>>, vector<8x48xf32>,
    return
  }
  func.func @transform_0(%arg0: i32) -> (i32, i32) {
    %c0_i32 = arith.constant 0 : i32
    %c0_i32_0 = arith.constant 0 : i32
    return %arg0, %c0_i32 : i32, i32
  }
  func.func @transform_1(%arg0: i32) -> (i32, i32) {
    %c0_i32 = arith.constant 0 : i32
    %c0_i32_0 = arith.constant 0 : i32
    return %arg0, %c0_i32 : i32, i32
  }
  func.func @transform_2(%arg0: i32) -> (i32, i32) {
    %c0_i32 = arith.constant 0 : i32
    %c0_i32_0 = arith.constant 0 : i32
    return %arg0, %c0_i32 : i32, i32
  }
  func.func @transform_3(%arg0: i32) -> (i32, i32) {
    %c0_i32 = arith.constant 0 : i32
    %c0_i32_0 = arith.constant 0 : i32
    %c0_i32_1 = arith.constant 0 : i32
    return %c0_i32, %c0_i32_0 : i32, i32
  }
  func.func @transform_4(%arg0: i32) -> (i32, i32) {
    %c0_i32 = arith.constant 0 : i32
    %c0_i32_0 = arith.constant 0 : i32
    %c0_i32_1 = arith.constant 0 : i32
    return %c0_i32, %c0_i32_0 : i32, i32
  }
  func.func @transform_5(%arg0: i32) -> (i32, i32) {
    %c0_i32 = arith.constant 0 : i32
    %c0_i32_0 = arith.constant 0 : i32
    %c0_i32_1 = arith.constant 0 : i32
    return %c0_i32, %c0_i32_0 : i32, i32
  }
  func.func @transform_6(%arg0: i32) -> (i32, i32) {
    %c0_i32 = arith.constant 0 : i32
    %c0_i32_0 = arith.constant 0 : i32
    %c0_i32_1 = arith.constant 0 : i32
    return %c0_i32, %c0_i32_0 : i32, i32
  }
  func.func @transform_7(%arg0: i32) -> (i32, i32) {
    %c0_i32 = arith.constant 0 : i32
    %c0_i32_0 = arith.constant 0 : i32
    %c0_i32_1 = arith.constant 0 : i32
    return %c0_i32, %c0_i32_0 : i32, i32
  }
  func.func @transform_8(%arg0: i32) -> (i32, i32) {
    %c0_i32 = arith.constant 0 : i32
    %c0_i32_0 = arith.constant 0 : i32
    %c0_i32_1 = arith.constant 0 : i32
    return %c0_i32, %c0_i32_0 : i32, i32
  }
  func.func @transform_9(%arg0: i32) -> (i32, i32) {
    %c0_i32 = arith.constant 0 : i32
    %c0_i32_0 = arith.constant 0 : i32
    return %arg0, %c0_i32 : i32, i32
  }
}

</mosaic_0001>

<bundles_post_ra>
// kernel: tpu_custom_call.1
= control target key start
LH: loop header
LB: loop body
LE: loop exit
PB: predicated region body
PF: predicated region fallthrough
CT: control target
= control target key end

     0   :  { %14 = vsyncpa [#allocation3], 0  ;;  %s1108_s0 = inlined_call_operand.hbm [shape: f32[8,32], index: 0, kind: input, shape index: {}]   ;;  %s1109_s1 = inlined_call_operand.vmem [shape: f32[64,40], index: 1, kind: input, shape index: {}]   ;;  %s1110_s2 = inlined_call_operand.hbm [shape: f32[8,8], index: 2, kind: input, shape index: {}]   ;;  %s1111_s3 = inlined_call_operand.vmem [shape: f32[32,32], index: 3, kind: input, shape index: {}]   ;;  %s1112_s4 = inlined_call_operand.vmem [shape: f32[40,64], index: 4, kind: input, shape index: {}]   ;;  %s1113_s5 = inlined_call_operand.vmem [shape: f32[32,32], index: 5, kind: input, shape index: {}]   ;;  %s1114_s6 = inlined_call_operand.vmem [shape: f32[1,32], index: 6, kind: input, shape index: {}]   ;;  %s1115_s7 = inlined_call_operand.vmem [shape: f32[1,32], index: 7, kind: input, shape index: {}]   ;;  %s1116_s8 = inlined_call_operand.vmem [shape: f32[1,32], index: 8, kind: input, shape index: {}]   ;;  %s1117_s9 = inlined_call_operand.hbm [shape: f32[8,48], index: 9, kind: output, shape index: {}]  }
   0x1   :  { %15 = vsyncpa [#allocation6], 0 }
   0x2   :  { %16 = vsyncpa [#allocation4], 0  ;;  %s22_s11 = sshll.u32 %s1108_s0, 4  ;;  %s821_s12 = smov [#allocation2]   ;;  %s23_s11 = int_to_ptr.hbm [resolvable:$true] %s22_s11 }
   0x3   :  { %s24_s13 = sshll.u32 %s821_s12, 4  ;;  %s35_s16 = sshll.u32 %s1110_s2, 4  ;;  %s25_s13 = int_to_ptr.vmem [resolvable:$true] %s24_s13  ;;  %s36_s16 = int_to_ptr.hbm [resolvable:$true] %s35_s16 }
   0x4   :  { %27 = dma.hbm_to_vmem [thread:$0]  %s23_s11, 128, %s25_s13, [#allocation3]  }
   0x5   :  { %s822_s17 = smov [#allocation5]  }
   0x6   :  { %s37_s18 = sshll.u32 %s822_s17, 4  ;;  %s38_s18 = int_to_ptr.vmem [resolvable:$true] %s37_s18 }
   0x7   :  { %40 = dma.hbm_to_vmem [thread:$0]  %s36_s16, 128, %s38_s18, [#allocation6]  }
   0x8   :  { %815 = dma.done.wait [#allocation3], 128  }
   0x9   :  { %816 = vsyncadd [#allocation3], 4294967168 }
   0xa   :  { %817 = dma.done.wait [#allocation6], 128  }
   0xb   :  { %818 = vsyncadd [#allocation6], 4294967168  ;;  %v67_v0 = vld [vmem:[%s1111_s3 + $0x18] sm:$0xff]  ;;  %v104_v1 = vld [vmem:[%s1112_s4 + $0x20] sm:$0xff]  ;;  %vm68_vm0 = vcmask 261120   ;;  %vm105_vm1 = vcmask 326656  }
   0xc   :  { %v66_v2 = vld [vmem:[%s1111_s3 + $0x10] sm:$0xff]  ;;  %84 = vmatpush.msra.mxu2 %v67_v0  ;;  %141 = vmatpush.msra.mxu0 %v104_v1  ;;  %v103_v3 = vld [vmem:[%s1112_s4 + $0x18] sm:$0xff]  ;;  %v65_v4 = vld [vmem:[%s1111_s3 + $0x8] sm:$0xff]  ;;  %vm203_vm2 = vcmask 130048   ;;  %s823_s26 = smov 112   ;;  %vm246_vm3 = vcmask 1041409  }
   0xd   :  { %707 = vmatpush.msra.mxu1 %v104_v1  ;;  %708 = vmatpush.msra.mxu3 %v104_v1  ;;  %v102_v5 = vld [vmem:[%s1112_s4 + $0x10] sm:$0xff]  ;;  %v64_v6 = vld [vmem:[%s1111_s3] sm:$0xff]  ;;  %v101_v7 = vld [vmem:[%s1112_s4 + $0x8] sm:$0xff]  ;;  %vm248_vm4 = vcmask 1042434   ;;  %vm250_vm5 = vcmask 1043459   ;;  %vm252_vm6 = vcmask 1044484  }
   0xe   :  { %85 = vmatpush.msra.mxu2 %v66_v2  ;;  %142 = vmatpush.msra.mxu0 %v103_v3  ;;  %v909_v8 = vld [vmem:[#allocation2] sm:$0xff]  ;;  %v94_v11 = vld [vmem:[%s1109_s1 + $0x10] sm:$0xff]  ;;  %v97_v12 = vld [vmem:[%s1109_s1 + $0x28] sm:$0xff]  ;;  %vm254_vm7 = vcmask 1045509   ;;  %vm256_vm8 = vcmask 1046534   ;;  %vm258_vm9 = vcmask 1047559  }
   0xf   :  { %709 = vmatpush.msra.mxu1 %v103_v3  ;;  %710 = vmatpush.msra.mxu3 %v103_v3  ;;  %v100_v9 = vld [vmem:[%s1112_s4] sm:$0xff]  ;;  %v93_v13 = vld [vmem:[%s1109_s1 + $0x8] sm:$0xff]  ;;  %v95_v14 = vld [vmem:[%s1109_s1 + $0x18] sm:$0xff]  ;;  %vm262_vm11 = vcmask 64512   ;;  %s825_s27 = smov 32   ;;  %s826_s28 = smov 40  }
  0x10   :  { %86 = vmatpush.msra.mxu2 %v65_v4  ;;  %143 = vmatpush.msra.mxu0 %v102_v5  ;;  %v92_v10 = vld [vmem:[%s1109_s1] sm:$0xff]  ;;  %v98_v15 = vld [vmem:[%s1109_s1 + $0x30] sm:$0xff]  ;;  %v99_v17 = vld [vmem:[%s1109_s1 + $0x38] sm:$0xff]  ;;  %s828_s18 = smov [#allocation7]   ;;  %s686_s21 = sshll.u32 %s1117_s9, 4  ;;  %s687_s21 = int_to_ptr.hbm [resolvable:$true] %s686_s21 }
  0x11   :  { %711 = vmatpush.msra.mxu1 %v102_v5  ;;  %712 = vmatpush.msra.mxu3 %v102_v5  ;;  %v96_v16 = vld [vmem:[%s1109_s1 + $0x20] sm:$0xff]  ;;  %v236_v5 = vlaneseq  ;;  %s824_s1 = smov 96   ;;  %s684_s19 = sshll.u32 %s828_s18, 4  ;;  %s685_s19 = int_to_ptr.vmem [resolvable:$true] %s684_s19 }
  0x12   :  { %87 = vmatpush.msra.mxu2 %v64_v6  ;;  %144 = vmatpush.msra.mxu0 %v101_v7 }
  0x13   :  { %713 = vmatpush.msra.mxu1 %v101_v7  ;;  %714 = vmatpush.msra.mxu3 %v101_v7  ;;  %v994_v6 = vand.u32 127, %v236_v5 }
  0x14   :  { %697 = vmatmul.msk.f32.vlgmr.msra.gmra.mxu2 %vm68_vm0, %v909_v8  ;;  %145 = vmatpush.msra.mxu0 %v100_v9 }
  0x15   :  { %715 = vmatpush.msra.mxu1 %v100_v9  ;;  %716 = vmatpush.msra.mxu3 %v100_v9 }
  0x16   :  { %698 = vmatmul.msk.f32.vlgmr.msra.gmra.mxu0 %vm105_vm1, %v92_v10  ;;  %700 = vmatmul.msk.f32.vlgmr.msra.gmra.mxu1 %vm105_vm1, %v94_v11 }
  0x17   :  { %703 = vmatmul.msk.f32.vlgmr.msra.gmra.mxu3 %vm105_vm1, %v97_v12 }
  0x1e   :  { %699 = vmatmul.msk.f32.gmra.mxu0 %vm105_vm1, %v93_v13  ;;  %701 = vmatmul.msk.f32.gmra.mxu1 %vm105_vm1, %v95_v14 }
  0x1f   :  { %704 = vmatmul.msk.f32.gmra.mxu3 %vm105_vm1, %v98_v15 }
  0x26   :  { %702 = vmatmul.msk.f32.gmra.mxu1 %vm105_vm1, %v96_v16 }
  0x27   :  { %705 = vmatmul.msk.f32.gmra.mxu3 %vm105_vm1, %v99_v17 }
  0x93   :  { %v948_v18 = vpop.f32.mrf.mxu0  ;;  %v950_v20 = vpop.f32.mrf.mxu1 }
  0x97   :  { %v89_v19 = vpop.f32.mrf.mxu2 }
  0x98   :  { %v179_v21 = vperm.slane %v89_v19, 0  ;;  %v173_v22 = vrot.slane %v89_v19, 2  ;;  %v172_v23 = vrot.slane %v89_v19, 1  ;;  %v174_v27 = vrot.slane %v89_v19, 3 }
  0x99   :  { %v176_v35 = vrot.slane %v89_v19, 5  ;;  %v177_v40 = vrot.slane %v89_v19, 6  ;;  %v178_v48 = vrot.slane %v89_v19, 7  ;;  %v175_v52 = vrot.slane %v89_v19, 4 }
  0x9a   :  { %v195_v24 = vmul.f32 %v179_v21, %v948_v18  ;;  %v181_v25 = vperm.slane %v173_v22, 0  ;;  %v180_v29 = vperm.slane %v172_v23, 0  ;;  %v182_v31 = vperm.slane %v174_v27, 0  ;;  %v965_v37 = vpop.f32.mrf.mxu3 }
  0x9b   :  { %v956_v30 = vpop.f32.mrf.mxu0  ;;  %v960_v33 = vpop.f32.mrf.mxu1  ;;  %v184_v36 = vperm.slane %v176_v35, 0  ;;  %v185_v43 = vperm.slane %v177_v40, 0  ;;  %v186_v50 = vperm.slane %v178_v48, 0  ;;  %v183_v54 = vperm.slane %v175_v52, 0 }
  0x9c   :  { %282 = vrot.lane.b32.xlu0 %v195_v24, %s823_s26  ;;  %v204_v26 = vsel %vm203_vm2, %v195_v24, 0.0  ;;  %v197_v28 = vmul.f32 %v181_v25, %v950_v20  ;;  %v196_v32 = vmul.f32 %v180_v29, %v956_v30  ;;  %v198_v34 = vmul.f32 %v182_v31, %v960_v33 }
  0x9d   :  { %205 = vadd.xlane.f32.xlu2 %v204_v26  ;;  %v200_v38 = vmul.f32 %v184_v36, %v965_v37  ;;  %v62_v36 = vld [vmem:[#allocation5] sm:$0xff] }
  0x9e   :  { %286 = vrot.lane.b32.xlu1 %v197_v28, %s823_s26  ;;  %v207_v39 = vsel %vm203_vm2, %v196_v32, 0.0  ;;  %v213_v41 = vsel %vm203_vm2, %v198_v34, 0.0  ;;  %v210_v46 = vsel %vm203_vm2, %v197_v28, 0.0  ;;  %vm63_vm10 = vcmp.eq.f32.partialorder %v62_v36, 0.0 }
  0x9f   :  { %v219_v47 = vsel %vm203_vm2, %v200_v38, 0.0 }
  0xa2   :  { %v971_v42 = vpop.f32.mrf.mxu3 }
  0xa3   :  { %v201_v44 = vmul.f32 %v185_v43, %v971_v42  ;;  %v982_v53 = vpop.f32.mrf.mxu1 }
  0xa4   :  { %284 = vrot.lane.b32.xlu0 %v196_v32, %s823_s26  ;;  %v199_v55 = vmul.f32 %v183_v54, %v982_v53 }
  0xa5   :  { %v222_v45 = vsel %vm203_vm2, %v201_v44, 0.0 }
  0xa6   :  { %288 = vrot.lane.b32.xlu1 %v198_v34, %s823_s26  ;;  %v216_v56 = vsel %vm203_vm2, %v199_v55, 0.0 }
  0xaa   :  { %v978_v49 = vpop.f32.mrf.mxu3 }
  0xab   :  { %v202_v51 = vmul.f32 %v186_v50, %v978_v49 }
  0xad   :  { %v225_v1 = vsel %vm203_vm2, %v202_v51, 0.0 }
  0xb5   :  { %292 = vrot.lane.b32.xlu2 %v200_v38, %s823_s26 }
  0xce   :  { %208 = vadd.xlane.f32.xlu0 %v207_v39 }
  0xd0   :  { %214 = vadd.xlane.f32.xlu1 %v213_v41 }
  0xd8   :  { %223 = vadd.xlane.f32.xlu1 %v222_v45 }
  0xde   :  { %211 = vadd.xlane.f32.xlu2 %v210_v46 }
  0xe2   :  { %294 = vrot.lane.b32.xlu0 %v201_v44, %s823_s26 }
  0xe6   :  { %220 = vadd.xlane.f32.xlu2 %v219_v47 }
  0xf1   :  { %296 = vrot.lane.b32.xlu1 %v202_v51, %s823_s26 }
  0xfe   :  { %290 = vrot.lane.b32.xlu2 %v199_v55, %s823_s26 }
 0x10c   :  { %217 = vadd.xlane.f32.xlu0 %v216_v56 }
 0x10e   :  { %v283_v60 = vpop.permute.xlu0 %282 }
 0x10f   :  { %v306_v62 = vsel %vm203_vm2, %v283_v60, 0.0 }
 0x110   :  { %v206_v57 = vpop.xlane.xlu2 %205  ;;  %v287_v58 = vpop.permute.xlu1 %286 }
 0x111   :  { %v312_v59 = vsel %vm203_vm2, %v287_v58, 0.0  ;;  %v238_v9 = vperm.slane %v206_v57, %v994_v6 }
 0x114   :  { %313 = vadd.xlane.f32.xlu0 %v312_v59 }
 0x116   :  { %v285_v0 = vpop.permute.xlu0 %284 }
 0x117   :  { %v309_v2 = vsel %vm203_vm2, %v285_v0, 0.0 }
 0x118   :  { %v293_v61 = vpop.permute.xlu2 %292  ;;  %v289_v3 = vpop.permute.xlu1 %288 }
 0x119   :  { %v321_v63 = vsel %vm203_vm2, %v293_v61, 0.0  ;;  %v315_v4 = vsel %vm203_vm2, %v289_v3, 0.0 }
 0x11b   :  { %307 = vadd.xlane.f32.xlu1 %v306_v62 }
 0x11c   :  { %322 = vadd.xlane.f32.xlu0 %v321_v63 }
 0x124   :  { %226 = vadd.xlane.f32.xlu0 %v225_v1 }
 0x127   :  { %310 = vadd.xlane.f32.xlu2 %v309_v2 }
 0x12f   :  { %316 = vadd.xlane.f32.xlu2 %v315_v4 }
 0x141   :  { %v209_v7 = vpop.xlane.xlu0 %208 }
 0x142   :  { %v239_v10 = vperm.slane %v209_v7, %v994_v6 }
 0x143   :  { %v215_v16 = vpop.xlane.xlu1 %214 }
 0x144   :  { %v247_v11 = vsel %vm246_vm3, %v239_v10, %v238_v9  ;;  %v241_v31 = vperm.slane %v215_v16, %v994_v6 }
 0x14b   :  { %v224_v21 = vpop.xlane.xlu1 %223 }
 0x14c   :  { %v244_v39 = vperm.slane %v224_v21, %v994_v6 }
 0x151   :  { %v212_v12 = vpop.xlane.xlu2 %211 }
 0x152   :  { %v240_v13 = vperm.slane %v212_v12, %v994_v6 }
 0x154   :  { %v249_v14 = vsel %vm248_vm4, %v240_v13, %v247_v11  ;;  %v295_v15 = vpop.permute.xlu0 %294 }
 0x155   :  { %v324_v17 = vsel %vm203_vm2, %v295_v15, 0.0  ;;  %v251_v32 = vsel %vm250_vm5, %v241_v31, %v249_v14 }
 0x156   :  { %325 = vadd.xlane.f32.xlu2 %v324_v17 }
 0x159   :  { %v221_v19 = vpop.xlane.xlu2 %220 }
 0x15a   :  { %v243_v35 = vperm.slane %v221_v19, %v994_v6 }
 0x161   :  { %v291_v22 = vpop.permute.xlu2 %290 }
 0x162   :  { %v318_v23 = vsel %vm203_vm2, %v291_v22, 0.0 }
 0x163   :  { %319 = vadd.xlane.f32.xlu1 %v318_v23  ;;  %v297_v24 = vpop.permute.xlu1 %296 }
 0x164   :  { %v327_v25 = vsel %vm203_vm2, %v297_v24, 0.0 }
 0x16b   :  { %328 = vadd.xlane.f32.xlu1 %v327_v25 }
 0x17f   :  { %v218_v26 = vpop.xlane.xlu0 %217 }
 0x180   :  { %v242_v28 = vperm.slane %v218_v26, %v994_v6 }
 0x182   :  { %v253_v34 = vsel %vm252_vm6, %v242_v28, %v251_v32 }
 0x183   :  { %v255_v38 = vsel %vm254_vm7, %v243_v35, %v253_v34 }
 0x184   :  { %v257_v43 = vsel %vm256_vm8, %v244_v39, %v255_v38 }
 0x187   :  { %v314_v27 = vpop.xlane.xlu0 %313 }
 0x188   :  { %v340_v56 = vperm.slane %v314_v27, %v994_v6 }
 0x18e   :  { %v308_v48 = vpop.xlane.xlu1 %307 }
 0x18f   :  { %v323_v29 = vpop.xlane.xlu0 %322  ;;  %v338_v52 = vperm.slane %v308_v48, %v994_v6 }
 0x197   :  { %v227_v40 = vpop.xlane.xlu0 %226 }
 0x198   :  { %v245_v41 = vperm.slane %v227_v40, %v994_v6 }
 0x19a   :  { %v259_v44 = vsel %vm258_vm9, %v245_v41, %v257_v43  ;;  %v311_v47 = vpop.xlane.xlu2 %310 }
 0x19b   :  { %v261_v45 = vsel %vm63_vm10, -1e+10, %v259_v44  ;;  %v339_v50 = vperm.slane %v311_v47, %v994_v6 }
 0x19c   :  { %v263_v46 = vsel %vm262_vm11, %v261_v45, -inf }
 0x19d   :  { %264 = vmax.xlane.f32.xlu2 %v263_v46  ;;  %v346_v54 = vsel %vm246_vm3, %v339_v50, %v338_v52 }
 0x19e   :  { %v347_v58 = vsel %vm248_vm4, %v340_v56, %v346_v54 }
 0x1a2   :  { %v317_v51 = vpop.xlane.xlu2 %316 }
 0x1a3   :  { %v341_v55 = vperm.slane %v317_v51, %v994_v6 }
 0x1a5   :  { %v348_v60 = vsel %vm250_vm5, %v341_v55, %v347_v58 }
 0x1b5   :  { %494 = vrot.lane.b32.xlu2 %v948_v18, %s824_s1  ;;  %v343_v18 = vperm.slane %v323_v29, %v994_v6 }
 0x1c9   :  { %v326_v63 = vpop.xlane.xlu2 %325 }
 0x1ca   :  { %v344_v0 = vperm.slane %v326_v63, %v994_v6 }
 0x1d6   :  { %v320_v57 = vpop.xlane.xlu1 %319 }
 0x1d7   :  { %v342_v59 = vperm.slane %v320_v57, %v994_v6 }
 0x1d9   :  { %v349_v61 = vsel %vm252_vm6, %v342_v59, %v348_v60 }
 0x1da   :  { %v350_v62 = vsel %vm254_vm7, %v343_v18, %v349_v61 }
 0x1db   :  { %v351_v3 = vsel %vm256_vm8, %v344_v0, %v350_v62  ;;  %v585_v62 = vld [vmem:[%s1113_s5 + $0x18] sm:$0xff]  ;;  %v584_v0 = vld [vmem:[%s1113_s5 + $0x10] sm:$0xff] }
 0x1dc   :  { %619 = vmatpush.msrb.mxu2 %v585_v62 }
 0x1de   :  { %v329_v1 = vpop.xlane.xlu1 %328  ;;  %620 = vmatpush.msrb.mxu2 %v584_v0 }
 0x1df   :  { %v345_v2 = vperm.slane %v329_v1, %v994_v6  ;;  %v583_v1 = vld [vmem:[%s1113_s5 + $0x8] sm:$0xff] }
 0x1e0   :  { %621 = vmatpush.msrb.mxu2 %v583_v1 }
 0x1e1   :  { %v352_v4 = vsel %vm258_vm9, %v345_v2, %v351_v3 }
 0x1e2   :  { %v354_v7 = vsel %vm63_vm10, -1e+10, %v352_v4  ;;  %v582_v4 = vld [vmem:[%s1113_s5] sm:$0xff] }
 0x1e3   :  { %v355_v9 = vsel %vm262_vm11, %v354_v7, -inf  ;;  %622 = vmatpush.msrb.mxu2 %v582_v4 }
 0x1e4   :  { %356 = vmax.xlane.f32.xlu0 %v355_v9 }
 0x1f8   :  { %496 = vrot.lane.b32.xlu0 %v956_v30, %s824_s1 }
 0x200   :  { %498 = vrot.lane.b32.xlu0 %v950_v20, %s824_s1 }
 0x208   :  { %500 = vrot.lane.b32.xlu0 %v960_v33, %s824_s1 }
 0x210   :  { %502 = vrot.lane.b32.xlu0 %v982_v53, %s824_s1  ;;  %v265_v6 = vpop.xlane.xlu2 %264  ;;  %v368_v53 = vshrl.u32 %v236_v5, 7 }
 0x211   :  { %v266_v10 = vsub.f32 %v261_v45, %v265_v6 }
 0x212   :  { %727 = vset.pattern.permute.xlu2 %v368_v53  ;;  %726 = vset.pattern.permute.xlu1 %v368_v53 }
 0x213   :  { %v267_v11 = vmul.f32 1.442695, %v266_v10  ;;  %725 = vset.pattern.permute.xlu0 %v368_v53 }
 0x215   :  { %731 = vpow2.f32 %v267_v11 }
 0x218   :  { %504 = vrot.lane.b32.xlu0 %v965_v37, %s824_s1  ;;  %v495_v27 = vpop.permute.xlu2 %494 }
 0x21b   :  { %v732_v12 = vpop.eup %731 }
 0x21c   :  { %v269_v13 = vsel %vm262_vm11, %v732_v12, 0.0 }
 0x21d   :  { %270 = vadd.xlane.f32.xlu1 %v269_v13 }
 0x257   :  { %v357_v30 = vpop.xlane.xlu0 %356 }
 0x258   :  { %v358_v14 = vsub.f32 %v354_v7, %v357_v30 }
 0x25a   :  { %v359_v20 = vmul.f32 1.442695, %v358_v14 }
 0x25c   :  { %733 = vpow2.f32 %v359_v20 }
 0x262   :  { %v734_v15 = vpop.eup %733 }
 0x263   :  { %v361_v33 = vsel %vm262_vm11, %v734_v15, 0.0 }
 0x264   :  { %362 = vadd.xlane.f32.xlu2 %v361_v33 }
 0x26a   :  { %v497_v43 = vpop.permute.xlu0 %496 }
 0x272   :  { %v499_v45 = vpop.permute.xlu0 %498 }
 0x27a   :  { %v501_v47 = vpop.permute.xlu0 %500 }
 0x290   :  { %v271_v16 = vpop.xlane.xlu1 %270 }
 0x291   :  { %735 = vrcp.f32 %v271_v16 }
 0x297   :  { %v736_v37 = vpop.eup %735 }
 0x298   :  { %v273_v17 = vmul.f32 %v736_v37, %v732_v12 }
 0x29a   :  { %v373_v19 = vperm.slane %v273_v17, 1  ;;  %v366_v21 = vperm.slane %v273_v17, 0  ;;  %v380_v22 = vperm.slane %v273_v17, 2  ;;  %v387_v23 = vperm.slane %v273_v17, 3 }
 0x29b   :  { %v394_v24 = vperm.slane %v273_v17, 4  ;;  %v401_v5 = vperm.slane %v273_v17, 5  ;;  %v408_v25 = vperm.slane %v273_v17, 6  ;;  %v415_v26 = vperm.slane %v273_v17, 7 }
 0x29c   :  { %378 = vperm.xlu1 %726, %v373_v19   ;;  %371 = vperm.xlu0 %725, %v366_v21  }
 0x29d   :  { %385 = vperm.xlu2 %727, %v380_v22  }
 0x2a4   :  { %392 = vperm.xlu1 %726, %v387_v23   ;;  %506 = vrot.lane.b32.xlu0 %v971_v42, %s824_s1 }
 0x2ac   :  { %399 = vperm.xlu1 %726, %v394_v24  }
 0x2b4   :  { %406 = vperm.xlu1 %726, %v401_v5  }
 0x2bc   :  { %413 = vperm.xlu1 %726, %v408_v25  }
 0x2c4   :  { %420 = vperm.xlu1 %726, %v415_v26  }
 0x2d7   :  { %v363_v28 = vpop.xlane.xlu2 %362 }
 0x2d8   :  { %737 = vrcp.f32 %v363_v28 }
 0x2de   :  { %v738_v29 = vpop.eup %737 }
 0x2df   :  { %v365_v31 = vmul.f32 %v738_v29, %v734_v15 }
 0x2e1   :  { %v429_v32 = vperm.slane %v365_v31, 1  ;;  %v422_v34 = vperm.slane %v365_v31, 0  ;;  %v436_v35 = vperm.slane %v365_v31, 2  ;;  %v443_v36 = vperm.slane %v365_v31, 3 }
 0x2e2   :  { %v450_v42 = vperm.slane %v365_v31, 4  ;;  %v457_v38 = vperm.slane %v365_v31, 5  ;;  %v464_v39 = vperm.slane %v365_v31, 6  ;;  %v471_v40 = vperm.slane %v365_v31, 7 }
 0x2e3   :  { %434 = vperm.xlu1 %726, %v429_v32   ;;  %427 = vperm.xlu2 %727, %v422_v34  }
 0x2eb   :  { %441 = vperm.xlu1 %726, %v436_v35   ;;  %448 = vperm.xlu2 %727, %v443_v36  }
 0x2f3   :  { %508 = vrot.lane.b32.xlu1 %v978_v49, %s824_s1  ;;  %455 = vperm.xlu2 %727, %v450_v42   ;;  %v503_v49 = vpop.permute.xlu0 %502 }
 0x2f7   :  { %v386_v48 = vpop.permute.xlu2 %385 }
 0x2fb   :  { %668 = vrot.lane.b32.xlu1 %v273_v17, %s825_s27  ;;  %462 = vperm.xlu2 %727, %v457_v38   ;;  %v505_v54 = vpop.permute.xlu0 %504 }
 0x303   :  { %672 = vrot.lane.b32.xlu1 %v365_v31, %s826_s28  ;;  %469 = vperm.xlu2 %727, %v464_v39  }
 0x30b   :  { %476 = vperm.xlu2 %727, %v471_v40  }
 0x30e   :  { %v379_v41 = vpop.permute.xlu1 %378  ;;  %v372_v56 = vpop.permute.xlu0 %371 }
 0x316   :  { %v393_v44 = vpop.permute.xlu1 %392  ;;  %v507_v24 = vpop.permute.xlu0 %506 }
 0x31e   :  { %v400_v46 = vpop.permute.xlu1 %399 }
 0x326   :  { %v407_v50 = vpop.permute.xlu1 %406 }
 0x32e   :  { %v414_v52 = vpop.permute.xlu1 %413 }
 0x336   :  { %v1052_v57 = vpop.permute.xlu1 %420 }
 0x33d   :  { %v428_v51 = vpop.permute.xlu2 %427 }
 0x33e   :  { %v478_v58 = vsel %vm203_vm2, %v372_v56, %v428_v51 }
 0x33f   :  { %v518_v60 = vmul.f32 %v495_v27, %v478_v58 }
 0x341   :  { %v526_v3 = vsel %vm68_vm0, %v518_v60, 0.0 }
 0x342   :  { %v527_v12 = vrot.slane %v526_v3, 4 }
 0x344   :  { %v528_v37 = vadd.f32 %v527_v12, %v526_v3 }
 0x345   :  { %v449_v55 = vpop.permute.xlu2 %448 }
 0x346   :  { %v481_v18 = vsel %vm203_vm2, %v393_v44, %v449_v55  ;;  %v529_v28 = vrot.slane %v528_v37, 2 }
 0x347   :  { %v521_v63 = vmul.f32 %v501_v47, %v481_v18 }
 0x349   :  { %v547_v6 = vsel %vm68_vm0, %v521_v63, 0.0 }
 0x34a   :  { %v548_v20 = vrot.slane %v547_v6, 4 }
 0x34c   :  { %v549_v21 = vadd.f32 %v548_v20, %v547_v6 }
 0x34d   :  { %v456_v59 = vpop.permute.xlu2 %455 }
 0x34e   :  { %v482_v61 = vsel %vm203_vm2, %v400_v46, %v456_v59  ;;  %v550_v34 = vrot.slane %v549_v21, 2 }
 0x34f   :  { %v522_v2 = vmul.f32 %v503_v49, %v482_v61 }
 0x350   :  { %v551_v47 = vadd.f32 %v550_v34, %v549_v21 }
 0x351   :  { %v554_v13 = vsel %vm68_vm0, %v522_v2, 0.0 }
 0x352   :  { %v555_v53 = vrot.slane %v554_v13, 4  ;;  %v552_v18 = vrot.slane %v551_v47, 1 }
 0x354   :  { %v556_v5 = vadd.f32 %v555_v53, %v554_v13 }
 0x355   :  { %v435_v7 = vpop.permute.xlu1 %434  ;;  %v463_v9 = vpop.permute.xlu2 %462 }
 0x356   :  { %v479_v10 = vsel %vm203_vm2, %v379_v41, %v435_v7  ;;  %v483_v11 = vsel %vm203_vm2, %v407_v50, %v463_v9  ;;  %v557_v38 = vrot.slane %v556_v5, 2  ;;  %v530_v41 = vadd.f32 %v529_v28, %v528_v37 }
 0x357   :  { %v519_v30 = vmul.f32 %v497_v43, %v479_v10  ;;  %v523_v14 = vmul.f32 %v505_v54, %v483_v11  ;;  %v553_v9 = vadd.f32 %v552_v18, %v551_v47 }
 0x358   :  { %v531_v54 = vrot.slane %v530_v41, 1 }
 0x359   :  { %v533_v15 = vsel %vm68_vm0, %v519_v30, 0.0  ;;  %v561_v33 = vsel %vm68_vm0, %v523_v14, 0.0 }
 0x35a   :  { %v534_v16 = vrot.slane %v533_v15, 4  ;;  %v562_v19 = vrot.slane %v561_v33, 4  ;;  %v532_v1 = vadd.f32 %v531_v54, %v530_v41 }
 0x35c   :  { %v535_v17 = vadd.f32 %v534_v16, %v533_v15  ;;  %v563_v32 = vadd.f32 %v562_v19, %v561_v33  ;;  %v728_v19 = vld [vmem:[%s1114_s6] ss:$0 sm:$0xff] }
 0x35d   :  { %v442_v22 = vpop.permute.xlu1 %441  ;;  %v470_v23 = vpop.permute.xlu2 %469 }
 0x35e   :  { %v536_v25 = vrot.slane %v535_v17, 2  ;;  %v480_v26 = vsel %vm203_vm2, %v386_v48, %v442_v22  ;;  %v484_v27 = vsel %vm203_vm2, %v414_v52, %v470_v23  ;;  %v564_v43 = vrot.slane %v563_v32, 2 }
 0x35f   :  { %v520_v29 = vmul.f32 %v499_v45, %v480_v26  ;;  %v524_v31 = vmul.f32 %v507_v24, %v484_v27  ;;  %v558_v45 = vadd.f32 %v557_v38, %v556_v5  ;;  %v827_v5 = vmov 32.0  }
 0x360   :  { %v537_v35 = vadd.f32 %v536_v25, %v535_v17  ;;  %v565_v58 = vadd.f32 %v564_v43, %v563_v32  ;;  %739 = vrcp.f32 %v827_v5 }
 0x361   :  { %v540_v36 = vsel %vm68_vm0, %v520_v29, 0.0  ;;  %v568_v42 = vsel %vm68_vm0, %v524_v31, 0.0  ;;  %v559_v62 = vrot.slane %v558_v45, 1 }
 0x362   :  { %v541_v39 = vrot.slane %v540_v36, 4  ;;  %v569_v40 = vrot.slane %v568_v42, 4  ;;  %v538_v48 = vrot.slane %v537_v35, 1  ;;  %v566_v3 = vrot.slane %v565_v58, 1 }
 0x363   :  { %v560_v6 = vadd.f32 %v559_v62, %v558_v45 }
 0x364   :  { %v542_v44 = vadd.f32 %v541_v39, %v540_v36  ;;  %v570_v46 = vadd.f32 %v569_v40, %v568_v42  ;;  %v539_v60 = vadd.f32 %v538_v48, %v537_v35  ;;  %v567_v30 = vadd.f32 %v566_v3, %v565_v58 }
 0x365   :  { %v509_v50 = vpop.permute.xlu1 %508  ;;  %v477_v49 = vpop.permute.xlu2 %476 }
 0x366   :  { %v543_v51 = vrot.slane %v542_v44, 2  ;;  %v485_v52 = vsel %vm203_vm2, %v1052_v57, %v477_v49  ;;  %v571_v55 = vrot.slane %v570_v46, 2  ;;  %v598_v57 = vsel %vm246_vm3, %v539_v60, %v532_v1  ;;  %v740_v25 = vpop.eup %739 }
 0x367   :  { %v525_v56 = vmul.f32 %v509_v50, %v485_v52  ;;  %v632_v26 = vmul.f32 32.0, %v740_v25  ;;  %vm636_vm12 = vweird.f32 %v740_v25  ;;  %v729_v50 = vld [vmem:[%s1115_s7] ss:$0 sm:$0xff]  ;;  %vm677_vm2 = vcmask 392192  }
 0x368   :  { %v544_v59 = vadd.f32 %v543_v51, %v542_v44  ;;  %v572_v2 = vadd.f32 %v571_v55, %v570_v46  ;;  %v730_v51 = vld [vmem:[%s1116_s8] ss:$0 sm:$0xff] }
 0x369   :  { %v575_v61 = vsel %vm68_vm0, %v525_v56, 0.0  ;;  %v633_v27 = vsub.f32 1.0, %v632_v26 }
 0x36a   :  { %v545_v63 = vrot.slane %v544_v59, 1  ;;  %v576_v0 = vrot.slane %v575_v61, 4  ;;  %v573_v12 = vrot.slane %v572_v2, 1 }
 0x36b   :  { %v634_v28 = vmul.f32 %v740_v25, %v633_v27 }
 0x36c   :  { %v546_v4 = vadd.f32 %v545_v63, %v544_v59  ;;  %v577_v7 = vadd.f32 %v576_v0, %v575_v61  ;;  %v574_v53 = vadd.f32 %v573_v12, %v572_v2 }
 0x36d   :  { %v635_v29 = vadd.f32 %v740_v25, %v634_v28  ;;  %v669_v47 = vpop.permute.xlu1 %668 }
 0x36e   :  { %v599_v10 = vsel %vm248_vm4, %v546_v4, %v598_v57  ;;  %v578_v11 = vrot.slane %v577_v7, 2 }
 0x36f   :  { %v600_v13 = vsel %vm250_vm5, %v553_v9, %v599_v10  ;;  %v637_v31 = vsel %vm636_vm12, %v740_v25, %v635_v29 }
 0x370   :  { %v579_v14 = vadd.f32 %v578_v11, %v577_v7  ;;  %v601_v20 = vsel %vm252_vm6, %v560_v6, %v600_v13 }
 0x371   :  { %v602_v33 = vsel %vm254_vm7, %v567_v30, %v601_v20 }
 0x372   :  { %v580_v15 = vrot.slane %v579_v14, 1  ;;  %v603_v37 = vsel %vm256_vm8, %v574_v53, %v602_v33 }
 0x374   :  { %v581_v16 = vadd.f32 %v580_v15, %v579_v14 }
 0x375   :  { %v673_v55 = vpop.permute.xlu1 %672 }
 0x376   :  { %v604_v17 = vsel %vm258_vm9, %v581_v16, %v603_v37 }
 0x377   :  { %706 = vmatmul.msk.f32.vlgmr.msrb.gmra.mxu2 %vm68_vm0, %v604_v17 }
 0x3fa   :  { %v624_v21 = vpop.f32.mrf.mxu2 }
 0x3fb   :  { %v625_v22 = vadd.f32 %v728_v19, %v624_v21 }
 0x3fd   :  { %v627_v23 = vadd.f32 %v625_v22, %v909_v8 }
 0x3ff   :  { %v628_v24 = vsel %vm68_vm0, %v627_v23, 0.0 }
 0x400   :  { %629 = vadd.xlane.f32.xlu2 %v628_v24 }
 0x473   :  { %v630_v32 = vpop.xlane.xlu2 %629 }
 0x474   :  { %v638_v34 = vmul.f32 %v637_v31, %v630_v32 }
 0x476   :  { %v639_v35 = vsub.f32 %v627_v23, %v638_v34 }
 0x478   :  { %v640_v36 = vmul.f32 %v639_v35, %v639_v35 }
 0x47a   :  { %v641_v42 = vsel %vm68_vm0, %v640_v36, 0.0 }
 0x47b   :  { %642 = vadd.xlane.f32.xlu0 %v641_v42 }
 0x4ee   :  { %v643_v8 = vpop.xlane.xlu0 %642 }
 0x4ef   :  { %v644_v38 = vmul.f32 %v643_v8, %v637_v31 }
 0x4f1   :  { %v645_v39 = vadd.f32 1e-05, %v644_v38 }
 0x4f3   :  { %741 = vrsqrt.f32 %v645_v39  ;;  %vm652_vm14 = vweird.f32 %v645_v39 }
 0x4f9   :  { %v742_v40 = vpop.eup %741 }
 0x4fa   :  { %v647_v41 = vmul.f32 %v742_v40, %v645_v39  ;;  %vm653_vm13 = vweird.f32 %v742_v40 }
 0x4fb   :  { %vm654_vm15 = vmor %vm652_vm14, %vm653_vm13 }
 0x4fc   :  { %v648_v43 = vmul.f32 %v742_v40, %v647_v41 }
 0x4fe   :  { %v649_v44 = vmul.f32 0.5, %v648_v43 }
 0x500   :  { %v650_v46 = vsub.f32 1.5, %v649_v44 }
 0x502   :  { %v651_v48 = vmul.f32 %v742_v40, %v650_v46 }
 0x504   :  { %v655_v49 = vsel %vm654_vm15, %v742_v40, %v651_v48 }
 0x505   :  { %v656_v45 = vmul.f32 %v655_v49, %v639_v35 }
 0x507   :  { %v661_v52 = vmul.f32 %v729_v50, %v656_v45 }
 0x509   :  { %v666_v54 = vadd.f32 %v730_v51, %v661_v52 }
 0x50b   :  { %v675_v56 = vsel %vm68_vm0, %v666_v54, %v669_v47 }
 0x50c   :  { %v676_v58 = vsel %vm105_vm1, %v675_v56, %v673_v55 }
 0x50d   :  { %678 = vst.msk [vmem:[#allocation7] sm:$0xff] %vm677_vm2, %v676_v58 }
 0x50e   :  { %689 = dma.vmem_to_hbm [thread:$0]  %s685_s19, 128, %s687_s21, [#allocation4]  }
 0x50f   :  { %819 = dma.done.wait [#allocation4], 128  }
 0x510   :  { %820 = vsyncadd [#allocation4], 4294967168 }
 0x511   :  { %694 = vsyncpa [#allocation3], 1 }
 0x512   :  { %695 = vsyncpa [#allocation6], 1 }
 0x513   :  { %696 = vsyncpa [#allocation4], 1 }

</bundles_post_ra>
